<compile_context>
chip_gen: v7x
topology: tpu7x:2x2x1
jax: 0.10.0
libtpu: 0.0.40
codegen_flags: <defaults>
</compile_context>

<pallas_src>
import functools

import jax
import jax.numpy as jnp
from jax.experimental import pallas as pl
from jax.experimental.pallas import tpu as pltpu


_LANE = 128                 # last-dim (lane) tiling unit
_SUBLANE = 8                # second-to-last-dim (sublane) tiling unit
_GRIDLESS_MAX_BATCH = 512   # up to this batch: one full-extent VMEM block
_BATCH_TILE = 512           # batch tile for the gridded path (multiple of 16)
_BATCH_TILE_BIG = 1024      # used when B >= 2048 (keeps >= 2 grid steps)


def _round_up(n, m):
    return ((n + m - 1) // m) * m


def _mlp_kernel(*refs, n_layers, activation, compute_dtype):
    """Fused MLP: out = L_N(act(... act(L_1(x)) ...)).

    refs = (x_ref, w1_ref, b1_ref, ..., wN_ref, bN_ref, out_ref).
    Each matmul runs on the MXU with f32 accumulation; the bias add and the
    activation (VPU relu / EUP tanh) run in f32, then h is downcast to
    compute_dtype (bf16 by default) for the next layer's matmul.  All
    intermediates stay in vregs/VMEM; only the final (B, out_dim) is stored.
    """
    x_ref = refs[0]
    out_ref = refs[-1]
    h = x_ref[...]
    for l in range(n_layers):
        w = refs[1 + 2 * l][...]
        b = refs[2 + 2 * l][...]          # bias kept in f32
        h = jnp.dot(h, w, preferred_element_type=jnp.float32) + b
        if l < n_layers - 1:
            h = jnp.maximum(h, 0.0) if activation == "relu" else jnp.tanh(h)
            h = h.astype(compute_dtype)
    out_ref[...] = h.astype(out_ref.dtype)


@functools.partial(jax.jit, static_argnames=("activation",))
def _forward(x, flat_params, *, activation):
    """Single jitted program: (tiny pad) -> one fused pallas_call -> (row slice)."""
    n_layers = len(flat_params) // 2
    B, Din = x.shape
    Din_p = flat_params[0].shape[0]          # round_up(Din, 8)
    out_dim = flat_params[-2].shape[-1]      # unpadded output width
    compute_dtype = flat_params[0].dtype

    if B <= _GRIDLESS_MAX_BATCH:
        tile = None
        B_pad = B                            # full-extent block: no batch pad
    else:
        tile = _BATCH_TILE_BIG if B >= 2 * _BATCH_TILE_BIG else _BATCH_TILE
        B_pad = tile * pl.cdiv(B, tile)      # guarantees >= 2 grid steps

    x = x.astype(compute_dtype)
    if B_pad != B or Din_p != Din:
        # Tiny pad: batch remainder + Din -> round_up(Din, 8) only.
        x = jnp.pad(x, ((0, B_pad - B), (0, Din_p - Din)))

    kernel = functools.partial(_mlp_kernel, n_layers=n_layers,
                               activation=activation,
                               compute_dtype=compute_dtype)
    out_shape = jax.ShapeDtypeStruct((B_pad, out_dim), jnp.float32)

    if tile is None:
        # Small batch: grid-less, everything as one full-extent VMEM block.
        vmem = pl.BlockSpec(memory_space=pltpu.MemorySpace.VMEM)
        out = pl.pallas_call(
            kernel,
            out_shape=out_shape,
            in_specs=[vmem] * (1 + 2 * n_layers),
            out_specs=vmem,
        )(x, *flat_params)
    else:
        # Large batch: tile only the batch dim ("parallel" -> megacore split on
        # v7x).  Weights/biases use constant index_maps and stay VMEM-resident.
        in_specs = [pl.BlockSpec((tile, Din_p), lambda i: (i, 0))]
        for l in range(n_layers):
            w, b = flat_params[2 * l], flat_params[2 * l + 1]
            in_specs.append(pl.BlockSpec(w.shape, lambda i: (0, 0)))
            in_specs.append(pl.BlockSpec(b.shape, lambda i: (0, 0)))
        out = pl.pallas_call(
            kernel,
            out_shape=out_shape,
            grid=(B_pad // tile,),
            in_specs=in_specs,
            out_specs=pl.BlockSpec((tile, out_dim), lambda i: (i, 0)),
            compiler_params=pltpu.CompilerParams(
                dimension_semantics=("parallel",)),
        )(x, *flat_params)

    return out if B_pad == B else out[:B]


class QNetworkPallas:
    """Pallas/JAX port of the PyTorch QNetwork MLP."""

    def __init__(self, input_dim, output_dim, activation_fn, hidden_dims=None,
                 key=None, param_dtype=jnp.bfloat16):
        if input_dim < 1 or (hidden_dims and any(h < 1 for h in hidden_dims)) \
                or output_dim < 1:
            raise ValueError("All dimension values must be >= 1")
        if activation_fn not in ("relu", "tanh"):
            raise ValueError("Supported activation functions: 'relu', 'tanh'")
        if key is None:
            key = jax.random.PRNGKey(0)
        self.activation_fn = activation_fn
        self.output_dim = output_dim
        self.param_dtype = param_dtype

        layer_sizes = ([input_dim] + list(hidden_dims) + [output_dim]
                       if hidden_dims else [input_dim, output_dim])
        n_layers = len(layer_sizes) - 1

        self.params = []      # unpadded f32 (in,out)/(1,out): reference use
        padded = []
        for i in range(n_layers):
            din, dout = layer_sizes[i], layer_sizes[i + 1]
            key, wk, bk = jax.random.split(key, 3)
            # Deterministic init mimicking torch.nn.Linear default:
            # U(-1/sqrt(fan_in), 1/sqrt(fan_in)); stored as (in, out).
            bound = 1.0 / float(din) ** 0.5
            w = jax.random.uniform(wk, (din, dout), jnp.float32, -bound, bound)
            b = jax.random.uniform(bk, (1, dout), jnp.float32, -bound, bound)
            self.params.append((w, b))
            # Padding policy (zero rows/cols/lanes are inert through relu/tanh):
            #   * layer-0 input dim : round up to 8 (sublane unit) only
            #   * hidden dims       : round up to 128 lanes (lane-dense matmuls)
            #   * final output dim  : left unpadded -> narrow (B, out_dim) store
            din_p = _round_up(din, _SUBLANE if i == 0 else _LANE)
            dout_p = dout if i == n_layers - 1 else _round_up(dout, _LANE)
            w_p = jnp.pad(w, ((0, din_p - din), (0, dout_p - dout)))
            b_p = jnp.pad(b, ((0, 0), (0, dout_p - dout)))
            padded.append(w_p.astype(param_dtype))   # bf16 weights by default
            padded.append(b_p)                       # bias stays f32 (tiny)
        self._flat_padded = tuple(padded)

    def __call__(self, x):
        return _forward(x, self._flat_padded, activation=self.activation_fn)


def _reference_forward(x, params, activation_fn, compute_dtype=jnp.float32):
    """Pure-JAX reference reproducing the kernel's cast pattern."""
    h = x.astype(compute_dtype)
    n = len(params)
    for i, (w, b) in enumerate(params):
        h = jnp.dot(h, w.astype(compute_dtype),
                    preferred_element_type=jnp.float32) + b
        if i < n - 1:
            h = jnp.maximum(h, 0.0) if activation_fn == "relu" else jnp.tanh(h)
            h = h.astype(compute_dtype)
    return h


if __name__ == "__main__":
    key = jax.random.PRNGKey(0)
    input_dim, output_dim, hidden_dims = 4, 8, [32, 32]

    # Case 1: tiny batch, f32 params -> grid-less fused path; exact check.
    net = QNetworkPallas(input_dim, output_dim, "relu", hidden_dims, key=key,
                         param_dtype=jnp.float32)
    x = jax.random.normal(jax.random.fold_in(key, 123), (2, input_dim),
                          jnp.float32)
    out = jax.block_until_ready(net(x))
    ref = _reference_forward(x, net.params, "relu", jnp.float32)
    assert out.shape == (2, output_dim)
    assert jnp.allclose(out, ref, atol=1e-5, rtol=1e-5), "relu/f32 mismatch"

    # Case 2: large batch, bf16 storage -> batch-tiled "parallel" grid path
    # (2 steps of 512), compared against a matching bf16-cast reference.
    net2 = QNetworkPallas(input_dim, output_dim, "tanh", hidden_dims,
                          key=jax.random.fold_in(key, 7),
                          param_dtype=jnp.bfloat16)
    x2 = jax.random.normal(jax.random.fold_in(key, 456), (1024, input_dim),
                           jnp.float32)
    out2 = jax.block_until_ready(net2(x2))
    ref2 = _reference_forward(x2, net2.params, "tanh", jnp.bfloat16)
    assert out2.shape == (1024, output_dim)
    assert jnp.allclose(out2, ref2, atol=5e-2, rtol=5e-2), "tanh/bf16 mismatch"

    print("KERNEL_OK")
</pallas_src>

<mosaic_0001>
module attributes {stable_mosaic.version = 11 : i64} {
  func.func @_mlp_kernel(%arg0: memref<2x8xf32, #tpu.memory_space<vmem>>, %arg1: memref<8x128xf32, #tpu.memory_space<vmem>>, %arg2: memref<1x128xf32, #tpu.memory_space<vmem>>, %arg3: memref<128x128xf32, #tpu.memory_space<vmem>>, %arg4: memref<1x128xf32, #tpu.memory_space<vmem>>, %arg5: memref<128x8xf32, #tpu.memory_space<vmem>>, %arg6: memref<1x8xf32, #tpu.memory_space<vmem>>, %arg7: memref<2x8xf32, #tpu.memory_space<vmem>>) attributes {dimension_semantics = [], scalar_prefetch = 0 : i64, scratch_operands = 0 : i64, tpu.core_type = #tpu.core_type<tc>} {
    %c0 = arith.constant 0 : index
    %c0_0 = arith.constant 0 : index
    %0 = vector.load %arg0[%c0, %c0_0] : memref<2x8xf32, #tpu.memory_space<vmem>>, vector<2x8xf32>
    %c0_1 = arith.constant 0 : index
    %c0_2 = arith.constant 0 : index
    %1 = vector.load %arg1[%c0_1, %c0_2] : memref<8x128xf32, #tpu.memory_space<vmem>>, vector<8x128xf32>
    %c0_3 = arith.constant 0 : index
    %c0_4 = arith.constant 0 : index
    %2 = vector.load %arg2[%c0_3, %c0_4] : memref<1x128xf32, #tpu.memory_space<vmem>>, vector<1x128xf32>
    %cst = arith.constant dense<0.000000e+00> : vector<2x128xf32>
    %3 = tpu.matmul %0, %1, %cst {dimension_numbers = #tpu.dot_dimension_numbers<[1], [0], [0], [1], [0, 0, 1, 1], [], []>} : vector<2x8xf32>, vector<8x128xf32>, vector<2x128xf32> -> vector<2x128xf32>
    %4 = vector.broadcast %2 : vector<1x128xf32> to vector<2x128xf32>
    %5 = arith.addf %3, %4 : vector<2x128xf32>
    %cst_5 = arith.constant 0.000000e+00 : f32
    %6 = vector.broadcast %cst_5 : f32 to vector<2x128xf32>
    %7 = arith.maximumf %5, %6 : vector<2x128xf32>
    %c0_6 = arith.constant 0 : index
    %c0_7 = arith.constant 0 : index
    %8 = vector.load %arg3[%c0_6, %c0_7] : memref<128x128xf32, #tpu.memory_space<vmem>>, vector<128x128xf32>
    %c0_8 = arith.constant 0 : index
    %c0_9 = arith.constant 0 : index
    %9 = vector.load %arg4[%c0_8, %c0_9] : memref<1x128xf32, #tpu.memory_space<vmem>>, vector<1x128xf32>
    %cst_10 = arith.constant dense<0.000000e+00> : vector<2x128xf32>
    %10 = tpu.matmul %7, %8, %cst_10 {dimension_numbers = #tpu.dot_dimension_numbers<[1], [0], [0], [1], [0, 0, 1, 1], [], []>} : vector<2x128xf32>, vector<128x128xf32>, vector<2x128xf32> -> vector<2x128xf32>
    %11 = vector.broadcast %9 : vector<1x128xf32> to vector<2x128xf32>
    %12 = arith.addf %10, %11 : vector<2x128xf32>
    %cst_11 = arith.constant 0.000000e+00 : f32
    %13 = vector.broadcast %cst_11 : f32 to vector<2x128xf32>
    %14 = arith.maximumf %12, %13 : vector<2x128xf32>
    %c0_12 = arith.constant 0 : index
    %c0_13 = arith.constant 0 : index
    %15 = vector.load %arg5[%c0_12, %c0_13] : memref<128x8xf32, #tpu.memory_space<vmem>>, vector<128x8xf32>
    %c0_14 = arith.constant 0 : index
    %c0_15 = arith.constant 0 : index
    %16 = vector.load %arg6[%c0_14, %c0_15] : memref<1x8xf32, #tpu.memory_space<vmem>>, vector<1x8xf32>
    %cst_16 = arith.constant dense<0.000000e+00> : vector<2x8xf32>
    %17 = tpu.matmul %14, %15, %cst_16 {dimension_numbers = #tpu.dot_dimension_numbers<[1], [0], [0], [1], [0, 0, 1, 1], [], []>} : vector<2x128xf32>, vector<128x8xf32>, vector<2x8xf32> -> vector<2x8xf32>
    %18 = vector.broadcast %16 : vector<1x8xf32> to vector<2x8xf32>
    %19 = arith.addf %17, %18 : vector<2x8xf32>
    %c0_17 = arith.constant 0 : index
    %c0_18 = arith.constant 0 : index
    %20 = vector.load %arg7[%c0_17, %c0_18] : memref<2x8xf32, #tpu.memory_space<vmem>>, vector<2x8xf32>
    tpu.vector_store %arg7[%c0_17, %c0_18], %19 {strides = array<i32>} : memref<2x8xf32, #tpu.memory_space<vmem>>, vector<2x8xf32>,
    return
  }
}

</mosaic_0001>

<bundles_post_ra>
// kernel: _forward.1
= control target key start
LH: loop header
LB: loop body
LE: loop exit
PB: predicated region body
PF: predicated region fallthrough
CT: control target
= control target key end

     0   :  { %vm36_vm0 = vcmask 64512   ;;  %v505_v2 = vmov 0.0   ;;  %vm506_vm1 = vmmov 0   ;;  %v507_v6 = vmov 0.0|0.0   ;;  %s691_s0 = inlined_call_operand.vmem [shape: f32[2,8], index: 0, kind: input, shape index: {}]   ;;  %s692_s1 = inlined_call_operand.vmem [shape: f32[8,128], index: 1, kind: input, shape index: {}]   ;;  %s693_s2 = inlined_call_operand.vmem [shape: f32[1,128], index: 2, kind: input, shape index: {}]   ;;  %s694_s3 = inlined_call_operand.vmem [shape: f32[128,128], index: 3, kind: input, shape index: {}]   ;;  %s695_s4 = inlined_call_operand.vmem [shape: f32[1,128], index: 4, kind: input, shape index: {}]   ;;  %s696_s5 = inlined_call_operand.vmem [shape: f32[128,8], index: 5, kind: input, shape index: {}]   ;;  %s697_s6 = inlined_call_operand.vmem [shape: f32[1,8], index: 6, kind: input, shape index: {}]   ;;  %s698_s7 = inlined_call_operand.hbm [shape: f32[2,8], index: 7, kind: output, shape index: {}]  }
   0x1   :  { %v28_v0 = vld [vmem:[%s692_s1] sm:$0xff]  ;;  %354 = vmatprep.subr.mxu0 %v505_v2  ;;  %356 = vmatprep.mubr.msk.f32.mxu0 %vm506_vm1, %v505_v2  ;;  %v112_v4 = vld [vmem:[%s694_s3 + $0x8] sm:$0xff]  ;;  %v113_v5 = vld [vmem:[%s694_s3 + $0x10] sm:$0xff] }
   0x2   :  { %v27_v1 = vld [vmem:[%s691_s0] sm:$0x3]  ;;  %355 = vmatpush3.msra.mxu0 %v28_v0  ;;  %429 = vmatprep.subr.bf16.mxu1 %v507_v6  ;;  %v114_v8 = vld [vmem:[%s694_s3 + $0x18] sm:$0xff]  ;;  %v116_v11 = vld [vmem:[%s694_s3 + $0x28] sm:$0xff] }
   0x3   :  { %v111_v3 = vld [vmem:[%s694_s3] sm:$0xff]  ;;  %357 = vmatmul.mubr.msk.f32.vlgmr.msra.gmra.mrb[0].mxu0 %vm36_vm0, %v27_v1  ;;  %391 = vmatprep.mubr.msk.f32.mxu1 %vm506_vm1, %v505_v2  ;;  %v433_v9 = vpack.c.bf16 %v114_v8, %v113_v5 }
   0x4   :  { %v430_v7 = vpack.c.bf16 %v112_v4, %v111_v3  ;;  %453 = vmatprep.subr.bf16.mxu0 %v507_v6  ;;  %v115_v10 = vld [vmem:[%s694_s3 + $0x20] sm:$0xff]  ;;  %426 = vmatprep.mubr.msk.f32.mxu0 %vm506_vm1, %v505_v2 }
   0x6   :  { %431 = vmatpush3.bf16.msra.mxu1 %v430_v7 }
   0x7   :  { %432 = vmatprep.subr.bf16.mxu1 %v507_v6 }
   0x8   :  { %12 = vsyncpa [#allocation3], 0  ;;  %v436_v12 = vpack.c.bf16 %v116_v11, %v115_v10  ;;  %v117_v13 = vld [vmem:[%s694_s3 + $0x30] sm:$0xff]  ;;  %v118_v14 = vld [vmem:[%s694_s3 + $0x38] sm:$0xff]  ;;  %s508_s20 = smov [#allocation2]   ;;  %vm298_vm2 = vcmask 58368  }
   0x9   :  { %v439_v15 = vpack.c.bf16 %v118_v14, %v117_v13  ;;  %v119_v16 = vld [vmem:[%s694_s3 + $0x40] sm:$0xff]  ;;  %v120_v17 = vld [vmem:[%s694_s3 + $0x48] sm:$0xff]  ;;  %v121_v19 = vld [vmem:[%s694_s3 + $0x50] sm:$0xff]  ;;  %s306_s21 = sshll.u32 %s508_s20, 4  ;;  %s307_s21 = int_to_ptr.vmem [resolvable:$true] %s306_s21 }
   0xa   :  { %434 = vmatpush3.bf16.msra.mxu1 %v433_v9  ;;  %v442_v18 = vpack.c.bf16 %v120_v17, %v119_v16  ;;  %v122_v20 = vld [vmem:[%s694_s3 + $0x58] sm:$0xff]  ;;  %v123_v22 = vld [vmem:[%s694_s3 + $0x60] sm:$0xff]  ;;  %v124_v23 = vld [vmem:[%s694_s3 + $0x68] sm:$0xff]  ;;  %p486_p1 = scmp.lt.s32.totalorder %s307_s21, %s307_s21 }
   0xb   :  { %435 = vmatprep.subr.bf16.mxu1 %v507_v6  ;;  %v445_v21 = vpack.c.bf16 %v122_v20, %v121_v19  ;;  %v448_v24 = vpack.c.bf16 %v124_v23, %v123_v22  ;;  %v125_v25 = vld [vmem:[%s694_s3 + $0x70] sm:$0xff]  ;;  %v126_v26 = vld [vmem:[%s694_s3 + $0x78] sm:$0xff]  ;;  %v205_v28 = vld [vmem:[%s696_s5] sm:$0xff] }
   0xc   :  { %v451_v27 = vpack.c.bf16 %v126_v26, %v125_v25  ;;  %v206_v29 = vld [vmem:[%s696_s5 + $0x8] sm:$0xff]  ;;  %v207_v30 = vld [vmem:[%s696_s5 + $0x10] sm:$0xff]  ;;  %v208_v32 = vld [vmem:[%s696_s5 + $0x18] sm:$0xff] }
   0xd   :  { %v454_v31 = vpack.c.bf16 %v206_v29, %v205_v28  ;;  %v457_v33 = vpack.c.bf16 %v208_v32, %v207_v30  ;;  %v209_v34 = vld [vmem:[%s696_s5 + $0x20] sm:$0xff]  ;;  %v210_v35 = vld [vmem:[%s696_s5 + $0x28] sm:$0xff]  ;;  %v211_v37 = vld [vmem:[%s696_s5 + $0x30] sm:$0xff] }
   0xe   :  { %437 = vmatpush3.bf16.msra.mxu1 %v436_v12  ;;  %v460_v36 = vpack.c.bf16 %v210_v35, %v209_v34  ;;  %v212_v38 = vld [vmem:[%s696_s5 + $0x38] sm:$0xff]  ;;  %v213_v40 = vld [vmem:[%s696_s5 + $0x40] sm:$0xff]  ;;  %v214_v41 = vld [vmem:[%s696_s5 + $0x48] sm:$0xff] }
   0xf   :  { %438 = vmatprep.subr.bf16.mxu1 %v507_v6  ;;  %455 = vmatpush3.bf16.msra.mxu0 %v454_v31  ;;  %v463_v39 = vpack.c.bf16 %v212_v38, %v211_v37  ;;  %v466_v42 = vpack.c.bf16 %v214_v41, %v213_v40  ;;  %v215_v43 = vld [vmem:[%s696_s5 + $0x50] sm:$0xff]  ;;  %v216_v44 = vld [vmem:[%s696_s5 + $0x58] sm:$0xff]  ;;  %v217_v46 = vld [vmem:[%s696_s5 + $0x60] sm:$0xff] }
  0x10   :  { %456 = vmatprep.subr.bf16.mxu0 %v507_v6  ;;  %v469_v45 = vpack.c.bf16 %v216_v44, %v215_v43  ;;  %v218_v47 = vld [vmem:[%s696_s5 + $0x68] sm:$0xff]  ;;  %v314_v49 = vld [vmem:[%s693_s2] ss:$0 sm:$0xff]  ;;  %v219_v54 = vld [vmem:[%s696_s5 + $0x70] sm:$0xff] }
  0x11   :  { %v472_v48 = vpack.c.bf16 %v218_v47, %v217_v46  ;;  %v220_v55 = vld [vmem:[%s696_s5 + $0x78] sm:$0xff]  ;;  %v316_v57 = vld [vmem:[%s695_s4] ss:$0 sm:$0xff]  ;;  %s481_s5 = scalar_lea.vmem %s307_s21, 32 }
  0x12   :  { %440 = vmatpush3.bf16.msra.mxu1 %v439_v15  ;;  %v475_v56 = vpack.c.bf16 %v220_v55, %v219_v54  ;;  %v317_v62 = vld [vmem:[%s697_s6] ss:$0 sm:$0xff]  ;;  %p482_p0 = scmp.ne.s32.totalorder %s307_s21, %s481_s5  ;;  %p487_p2 = scmp.lt.s32.totalorder %s481_s5, %s481_s5 }
  0x13   :  { %441 = vmatprep.subr.bf16.mxu1 %v507_v6  ;;  %458 = vmatpush3.bf16.msra.mxu0 %v457_v33 }
  0x14   :  { %459 = vmatprep.subr.bf16.mxu0 %v507_v6  ;;  %p488_p3 = por %p487_p2, %p486_p1 }
  0x16   :  { %443 = vmatpush3.bf16.msra.mxu1 %v442_v18  ;;  %p489_p4 = pnand %p488_p3, %p482_p0 }
  0x17   :  { %444 = vmatprep.subr.bf16.mxu1 %v507_v6  ;;  %461 = vmatpush3.bf16.msra.mxu0 %v460_v36 }
  0x18   :  { %462 = vmatprep.subr.bf16.mxu0 %v507_v6 }
  0x1a   :  { %446 = vmatpush3.bf16.msra.mxu1 %v445_v21 }
  0x1b   :  { %447 = vmatprep.subr.bf16.mxu1 %v507_v6  ;;  %464 = vmatpush3.bf16.msra.mxu0 %v463_v39 }
  0x1c   :  { %465 = vmatprep.subr.bf16.mxu0 %v507_v6 }
  0x1e   :  { %449 = vmatpush3.bf16.msra.mxu1 %v448_v24 }
  0x1f   :  { %450 = vmatprep.subr.bf16.mxu1 %v507_v6  ;;  %467 = vmatpush3.bf16.msra.mxu0 %v466_v42 }
  0x20   :  { %468 = vmatprep.subr.bf16.mxu0 %v507_v6 }
  0x22   :  { %452 = vmatpush3.bf16.msra.mxu1 %v451_v27 }
  0x23   :  { %470 = vmatpush3.bf16.msra.mxu0 %v469_v45 }
  0x24   :  { %471 = vmatprep.subr.bf16.mxu0 %v507_v6 }
  0x27   :  { %473 = vmatpush3.bf16.msra.mxu0 %v472_v48 }
  0x28   :  { %474 = vmatprep.subr.bf16.mxu0 %v507_v6 }
  0x2b   :  { %476 = vmatpush3.bf16.msra.mxu0 %v475_v56 }
  0xd6   :  { %v106_v50 = vpop.f32.mrb[0].mxu0 }
  0xd7   :  { %v107_v51 = vadd.f32 %v314_v49, %v106_v50  ;;  %v358_v52 = vpop.f32.mrb[1].mxu0 }
  0xd9   :  { %v110_v53 = vmax.f32 %v107_v51, 0.0 }
  0xdb   :  { %392 = vmatmul.mubr.f32.vlgmr.msra.gmra.mrb[0].mxu1 %v110_v53 }
 0x1ae   :  { %v200_v58 = vpop.f32.mrb[0].mxu1 }
 0x1af   :  { %v201_v59 = vadd.f32 %v316_v57, %v200_v58  ;;  %v393_v60 = vpop.f32.mrb[1].mxu1 }
 0x1b1   :  { %v204_v61 = vmax.f32 %v201_v59, 0.0 }
 0x1b3   :  { %427 = vmatmul.mubr.f32.vlgmr.msra.gmra.mrb[2].mxu0 %v204_v61 }
 0x286   :  { %v294_v63 = vpop.f32.mrb[2].mxu0 }
 0x287   :  { %v295_v0 = vadd.f32 %v317_v62, %v294_v63  ;;  %v428_v1 = vpop.f32.mrb[3].mxu0 }
 0x289   :  { %299 = vst.msk [vmem:[#allocation2] sm:$0x3] %vm298_vm2, %v295_v0 }
 0x28a   :  { %492 = shalt.err (!%p489_p4)
}
 0x28b   :  { %s493_s23 = scalar_lea.hbm %s698_s7, 32 }
 0x28c   :  { %p494_p5 = scmp.ne.s32.totalorder %s698_s7, %s493_s23  ;;  %p497_p6 = scmp.lt.u32.totalorder %s493_s23, %s698_s7 }
 0x28e   :  { %p499_p7 = pnand %p497_p6, %p494_p5 }
 0x290   :  { %502 = shalt.err (!%p499_p7)
}
 0x291   :  { %309 = dma.vmem_to_hbm [thread:$0]  %s307_s21, 32, %s698_s7, [#allocation3]  }
 0x292   :  { %503 = dma.done.wait [#allocation3], 32  }
 0x293   :  { %504 = vsyncadd [#allocation3], 4294967264 }
 0x294   :  { %313 = vsyncpa [#allocation3], 1 }

</bundles_post_ra>
